<compile_context>
chip_gen: v5e
topology: v5e:2x2
jax: 0.10.0
libtpu: 0.0.40
codegen_flags: <defaults>
</compile_context>

<pallas_src>
import functools

import jax
import jax.numpy as jnp
from jax.experimental import pallas as pl
from jax.experimental.pallas import tpu as pltpu


# --------------------------------------------------------------------------
# Tiling helpers
# --------------------------------------------------------------------------
def _pick_tile(n, target, multiple):
    """Largest divisor of n that is a multiple of `multiple` and <= target.

    Falls back to n itself (full extent), which is always a legal block dim.
    """
    if n <= target:
        return n
    cand = (target // multiple) * multiple
    while cand >= multiple:
        if n % cand == 0:
            return cand
        cand -= multiple
    return n


def _sublane_multiple(dtype):
    # bf16 packs 16 rows per sublane group; keep tiles multiples of 16 there.
    return 16 if jnp.dtype(dtype).itemsize == 2 else 8


def _vmem_limit(block_bytes):
    # Derived from actual buffer sizes, capped at v7x's 64 MiB physical VMEM.
    return int(min(max(2 * block_bytes, 32 * 1024 * 1024), 64 * 1024 * 1024))


# --------------------------------------------------------------------------
# Wide matmul kernels (projections / output projection)
# --------------------------------------------------------------------------
def _matmul_kernel(x_ref, w_ref, o_ref):
    # x_ref: (1, tt, D), w_ref: (D, tn), o_ref: (1, tt, tn)
    o_ref[0] = jnp.dot(x_ref[0], w_ref[...],
                       preferred_element_type=jnp.float32).astype(o_ref.dtype)


def _matmul_bias_kernel(x_ref, w_ref, b_ref, o_ref):
    acc = jnp.dot(x_ref[0], w_ref[...], preferred_element_type=jnp.float32)
    o_ref[0] = (acc + b_ref[...].astype(jnp.float32)).astype(o_ref.dtype)


def _linear(x, w, bias=None, *, out_dtype=None, row_tile=None, col_tile=None,
            sublane_mult=8):
    """(B, T, D) @ (D, N) [+ bias] -> (B, T, N) as a tiled Pallas matmul."""
    bsz, t, d = x.shape
    dw, n = w.shape
    assert dw == d
    out_dtype = x.dtype if out_dtype is None else out_dtype

    tt = _pick_tile(t, 256, sublane_mult) if row_tile is None else row_tile
    tn = _pick_tile(n, 512, 128) if col_tile is None else col_tile
    assert t % tt == 0 and n % tn == 0
    grid = (bsz, t // tt, n // tn)

    in_specs = [
        pl.BlockSpec((1, tt, d), lambda bi, ti, ni: (bi, ti, 0)),
        pl.BlockSpec((d, tn), lambda bi, ti, ni: (0, ni)),
    ]
    operands = [x, w]
    kernel = _matmul_kernel
    if bias is not None:
        bias2d = bias.reshape(1, n).astype(jnp.float32)
        in_specs.append(pl.BlockSpec((1, tn), lambda bi, ti, ni: (0, ni)))
        operands.append(bias2d)
        kernel = _matmul_bias_kernel

    isz = jnp.dtype(x.dtype).itemsize
    wsz = jnp.dtype(w.dtype).itemsize
    osz = jnp.dtype(out_dtype).itemsize
    block_bytes = 2 * (tt * d * isz + d * tn * wsz + tt * tn * osz) + 4 * tn

    flops = 2 * bsz * t * d * n
    bytes_accessed = bsz * t * d * isz + d * n * wsz + bsz * t * n * osz

    return pl.pallas_call(
        kernel,
        out_shape=jax.ShapeDtypeStruct((bsz, t, n), out_dtype),
        grid_spec=pltpu.PrefetchScalarGridSpec(
            num_scalar_prefetch=0,
            grid=grid,
            in_specs=in_specs,
            out_specs=pl.BlockSpec((1, tt, tn), lambda bi, ti, ni: (bi, ti, ni)),
        ),
        compiler_params=pltpu.CompilerParams(
            dimension_semantics=("parallel", "parallel", "parallel"),
            vmem_limit_bytes=_vmem_limit(block_bytes)),
        cost_estimate=pl.CostEstimate(flops=flops, transcendentals=0,
                                      bytes_accessed=bytes_accessed),
    )(*operands)


# --------------------------------------------------------------------------
# Flash-attention kernel (per-head batched, online softmax)
# --------------------------------------------------------------------------
def _flash_attention_kernel(q_ref, k_ref, v_ref, o_ref, m_scr, l_scr, acc_scr,
                            *, compute_dtype, approx_recip):
    """One grid step = (batch element, q tile, kv tile).

    q_ref : (1, H, tq, E)  pre-scaled, compute dtype (resident across kv axis)
    k_ref : (1, H, tk, E)  compute dtype
    v_ref : (1, H, tk, E)  compute dtype
    o_ref : (1, H, tq, E)  written on the last kv step
    m/l/acc scratch: f32 online-softmax state, persists across the kv axis.
    """
    ki = pl.program_id(2)

    @pl.when(ki == 0)
    def _init():
        m_scr[...] = jnp.full_like(m_scr, -jnp.inf)
        l_scr[...] = jnp.zeros_like(l_scr)
        acc_scr[...] = jnp.zeros_like(acc_scr)

    q = q_ref[0]                                                  # (H, tq, E)
    k = k_ref[0]                                                  # (H, tk, E)
    v = v_ref[0]                                                  # (H, tk, E)

    s = jnp.einsum('hqe,hke->hqk', q, k,
                   preferred_element_type=jnp.float32)            # (H, tq, tk)

    m_prev = m_scr[...]
    m_new = jnp.maximum(m_prev, jnp.max(s, axis=-1, keepdims=True))
    alpha = jnp.exp(m_prev - m_new)
    # Exponent in the compute dtype (bf16 EUP on v6e/v7x); accumulation in f32.
    p = jnp.exp((s - m_new).astype(compute_dtype))                # (H, tq, tk)

    l_scr[...] = alpha * l_scr[...] + jnp.sum(p, axis=-1, keepdims=True,
                                              dtype=jnp.float32)
    acc_scr[...] = alpha * acc_scr[...] + jnp.einsum(
        'hqk,hke->hqe', p, v, preferred_element_type=jnp.float32)
    m_scr[...] = m_new

    @pl.when(ki == pl.num_programs(2) - 1)
    def _finalize():
        inv_l = pl.reciprocal(l_scr[...], approx=approx_recip)
        o_ref[0] = (acc_scr[...] * inv_l).astype(o_ref.dtype)


# --------------------------------------------------------------------------
# Public wrapper: full SelfAttention forward
# --------------------------------------------------------------------------
def self_attention(x, wq, wkv, wout, bout, *, heads, dim_heads, kv=None,
                   q_tile=None, kv_tile=None, compute_dtype=jnp.bfloat16):
    """x: (B, T, D) -> (B, T, D). Optional kv: (B, S, D) (defaults to x)."""
    kv_in = x if kv is None else kv
    b, t, d = x.shape
    bk, s_len, dk = kv_in.shape
    assert bk == b and dk == d
    dim_hidden = heads * dim_heads
    assert wq.shape == (d, dim_hidden)
    assert wkv.shape == (d, 2 * dim_hidden)
    assert wout.shape == (dim_hidden, d)
    assert bout.shape == (d,)

    cdt = compute_dtype
    sub = _sublane_multiple(cdt)
    scale = float(dim_heads) ** -0.5

    # ---- cast / pre-scale parameters and activations ONCE (wrapper side) ----
    wq_c = (wq.astype(jnp.float32) * scale).astype(cdt)   # softmax scale folded into Wq
    wkv_c = wkv.astype(cdt)
    wout_c = wout.astype(cdt)
    x_c = x.astype(cdt)
    kv_c = kv_in.astype(cdt)

    # ---- projections: wide MXU matmuls, computed once for the whole sequence ----
    q_flat = _linear(x_c, wq_c, out_dtype=cdt, sublane_mult=sub)      # (B, T, H*E)
    kv_flat = _linear(kv_c, wkv_c, out_dtype=cdt, sublane_mult=sub)   # (B, S, 2*H*E)
    k_flat = kv_flat[..., :dim_hidden]
    v_flat = kv_flat[..., dim_hidden:]

    # Head layout plumbing outside the kernel (no in-kernel relayouts).
    def to_heads(z, length):
        return z.reshape(b, length, heads, dim_heads).transpose(0, 2, 1, 3)

    qh = to_heads(q_flat, t)        # (B, H, T, E)
    kh = to_heads(k_flat, s_len)    # (B, H, S, E)
    vh = to_heads(v_flat, s_len)    # (B, H, S, E)

    # ---- flash attention ----
    tq = _pick_tile(t, 256, sub) if q_tile is None else q_tile
    tk = _pick_tile(s_len, 256, sub) if kv_tile is None else kv_tile
    assert t % tq == 0 and s_len % tk == 0
    nq, nk = t // tq, s_len // tk

    kernel = functools.partial(
        _flash_attention_kernel, compute_dtype=cdt,
        approx_recip=(jnp.dtype(cdt) != jnp.dtype(jnp.float32)))

    csz = jnp.dtype(cdt).itemsize
    block_bytes = (2 * (heads * tq * dim_heads * csz          # q (double-buffered)
                        + 2 * heads * tk * dim_heads * csz    # k, v
                        + heads * tq * dim_heads * csz)       # out
                   + heads * tq * dim_heads * 4               # acc scratch
                   + 2 * heads * tq * 4)                      # m, l scratch

    flops = 2 * b * heads * t * s_len * dim_heads * 2         # scores + P@V
    transcendentals = b * heads * t * s_len                   # softmax exp
    bytes_accessed = csz * (b * heads * t * dim_heads                 # q
                            + nq * 2 * b * heads * s_len * dim_heads  # k, v re-streamed / q tile
                            + b * heads * t * dim_heads)              # out

    attn = pl.pallas_call(
        kernel,
        out_shape=jax.ShapeDtypeStruct((b, heads, t, dim_heads), cdt),
        grid_spec=pltpu.PrefetchScalarGridSpec(
            num_scalar_prefetch=0,
            grid=(b, nq, nk),
            in_specs=[
                pl.BlockSpec((1, heads, tq, dim_heads),
                             lambda bi, qi, ki: (bi, 0, qi, 0)),   # q
                pl.BlockSpec((1, heads, tk, dim_heads),
                             lambda bi, qi, ki: (bi, 0, ki, 0)),   # k
                pl.BlockSpec((1, heads, tk, dim_heads),
                             lambda bi, qi, ki: (bi, 0, ki, 0)),   # v
            ],
            out_specs=pl.BlockSpec((1, heads, tq, dim_heads),
                                   lambda bi, qi, ki: (bi, 0, qi, 0)),
            scratch_shapes=[
                pltpu.VMEM((heads, tq, 1), jnp.float32),             # running max
                pltpu.VMEM((heads, tq, 1), jnp.float32),             # running denom
                pltpu.VMEM((heads, tq, dim_heads), jnp.float32),     # running numerator
            ]),
        compiler_params=pltpu.CompilerParams(
            dimension_semantics=("parallel", "parallel", "arbitrary"),
            vmem_limit_bytes=_vmem_limit(block_bytes)),
        cost_estimate=pl.CostEstimate(flops=flops,
                                      transcendentals=transcendentals,
                                      bytes_accessed=bytes_accessed),
    )(qh, kh, vh)

    # ---- merge heads (XLA plumbing) + output projection (full H*E contraction) ----
    attn_flat = attn.transpose(0, 2, 1, 3).reshape(b, t, dim_hidden)
    out = _linear(attn_flat, wout_c, bias=bout, out_dtype=x.dtype,
                  sublane_mult=sub)
    return out


# --------------------------------------------------------------------------
# Pure-JAX reference mirroring the PyTorch forward exactly (f32)
# --------------------------------------------------------------------------
def self_attention_ref(x, wq, wkv, wout, bout, *, heads, dim_heads):
    b, t, d = x.shape
    e = dim_heads
    h = heads
    q = x @ wq
    kvp = x @ wkv
    k, v = jnp.split(kvp, 2, axis=-1)

    def merge_heads(z):
        return z.reshape(b, -1, h, e).transpose(0, 2, 1, 3).reshape(b * h, -1, e)

    q, k, v = map(merge_heads, (q, k, v))
    dots = jnp.einsum('bie,bje->bij', q, k) * (e ** -0.5)
    dots = jax.nn.softmax(dots, axis=-1)
    out = jnp.einsum('bij,bje->bie', dots, v)
    out = out.reshape(b, h, -1, e).transpose(0, 2, 1, 3).reshape(b, -1, h * e)
    return out @ wout + bout


if __name__ == "__main__":
    # Small shapes consistent with the module: SelfAttention(dim=32, heads=4)
    B, T, DIM, HEADS = 2, 8, 32, 4
    DIM_HEADS = DIM // HEADS          # 8
    DIM_HIDDEN = DIM_HEADS * HEADS    # 32

    key = jax.random.PRNGKey(0)
    kx, kq, kkv, kw, kb = jax.random.split(key, 5)

    x = jax.random.normal(kx, (B, T, DIM), dtype=jnp.float32)
    # Deterministic synthetic parameters (Linear weights stored as (in, out)).
    wq = jax.random.normal(kq, (DIM, DIM_HIDDEN), dtype=jnp.float32) * 0.1
    wkv = jax.random.normal(kkv, (DIM, 2 * DIM_HIDDEN), dtype=jnp.float32) * 0.1
    wout = jax.random.normal(kw, (DIM_HIDDEN, DIM), dtype=jnp.float32) * 0.1
    bout = jax.random.normal(kb, (DIM,), dtype=jnp.float32) * 0.1

    ref = self_attention_ref(x, wq, wkv, wout, bout,
                             heads=HEADS, dim_heads=DIM_HEADS)

    # f32 compute path (tight check of the online-softmax / tiling logic;
    # exact reciprocal on this path).
    out_f32 = self_attention(x, wq, wkv, wout, bout, heads=HEADS,
                             dim_heads=DIM_HEADS, compute_dtype=jnp.float32)
    out_f32 = jax.block_until_ready(out_f32)
    assert out_f32.shape == (B, T, DIM)
    assert jnp.allclose(out_f32, ref, atol=5e-3, rtol=5e-3), "f32 kernel mismatch"

    # bf16 MXU-operand path (default / performance configuration).
    out_bf16 = self_attention(x, wq, wkv, wout, bout, heads=HEADS,
                              dim_heads=DIM_HEADS, compute_dtype=jnp.bfloat16)
    out_bf16 = jax.block_until_ready(out_bf16)
    assert out_bf16.shape == (B, T, DIM)
    assert jnp.allclose(out_bf16.astype(jnp.float32), ref,
                        atol=5e-2, rtol=5e-2), "bf16 kernel mismatch"

    print("KERNEL_OK")
</pallas_src>

<mosaic_0001>
module attributes {stable_mosaic.version = 11 : i64} {
  func.func @_matmul_kernel(%arg0: i32, %arg1: i32, %arg2: i32, %arg3: memref<1x8x32xf32, #tpu.memory_space<vmem>>, %arg4: memref<32x32xf32, #tpu.memory_space<vmem>>, %arg5: memref<1x8x32xf32, #tpu.memory_space<vmem>>) attributes {dimension_semantics = [#tpu.dimension_semantics<parallel>, #tpu.dimension_semantics<parallel>, #tpu.dimension_semantics<parallel>], iteration_bounds = array<i64: 2, 1, 1>, scalar_prefetch = 0 : i64, scratch_operands = 0 : i64, tpu.core_type = #tpu.core_type<tc>, window_params = [{transform_indices = @transform_0, window_bounds = array<i64: 1, 8, 32>}, {transform_indices = @transform_1, window_bounds = array<i64: 32, 32>}, {transform_indices = @transform_2, window_bounds = array<i64: 1, 8, 32>}]} {
    %c0 = arith.constant 0 : index
    %c0_0 = arith.constant 0 : index
    %c0_1 = arith.constant 0 : index
    %0 = vector.load %arg3[%c0, %c0_0, %c0_1] : memref<1x8x32xf32, #tpu.memory_space<vmem>>, vector<1x8x32xf32>
    %1 = vector.shape_cast %0 : vector<1x8x32xf32> to vector<8x32xf32>
    %c0_2 = arith.constant 0 : index
    %c0_3 = arith.constant 0 : index
    %2 = vector.load %arg4[%c0_2, %c0_3] : memref<32x32xf32, #tpu.memory_space<vmem>>, vector<32x32xf32>
    %cst = arith.constant dense<0.000000e+00> : vector<8x32xf32>
    %3 = tpu.matmul %1, %2, %cst {dimension_numbers = #tpu.dot_dimension_numbers<[1], [0], [0], [1], [0, 0, 1, 1], [], []>} : vector<8x32xf32>, vector<32x32xf32>, vector<8x32xf32> -> vector<8x32xf32>
    %c0_4 = arith.constant 0 : index
    %c0_5 = arith.constant 0 : index
    %c0_6 = arith.constant 0 : index
    %4 = vector.load %arg5[%c0_4, %c0_5, %c0_6] : memref<1x8x32xf32, #tpu.memory_space<vmem>>, vector<1x8x32xf32>
    %5 = vector.shape_cast %4 : vector<1x8x32xf32> to vector<8x32xf32>
    %6 = vector.shape_cast %3 : vector<8x32xf32> to vector<1x8x32xf32>
    tpu.vector_store %arg5[%c0_4, %c0_5, %c0_6], %6 {strides = array<i32>} : memref<1x8x32xf32, #tpu.memory_space<vmem>>, vector<1x8x32xf32>,
    return
  }
  func.func @transform_0(%arg0: i32, %arg1: i32, %arg2: i32) -> (i32, i32, i32) {
    %c0_i32 = arith.constant 0 : i32
    %c0_i32_0 = arith.constant 0 : i32
    return %arg0, %arg1, %c0_i32 : i32, i32, i32
  }
  func.func @transform_1(%arg0: i32, %arg1: i32, %arg2: i32) -> (i32, i32) {
    %c0_i32 = arith.constant 0 : i32
    %c0_i32_0 = arith.constant 0 : i32
    return %c0_i32, %arg2 : i32, i32
  }
  func.func @transform_2(%arg0: i32, %arg1: i32, %arg2: i32) -> (i32, i32, i32) {
    %c0_i32 = arith.constant 0 : i32
    return %arg0, %arg1, %arg2 : i32, i32, i32
  }
}

</mosaic_0001>

<bundles_post_ra>
// kernel: tpu_custom_call.1
= control target key start
LH: loop header
LB: loop body
LE: loop exit
PB: predicated region body
PF: predicated region fallthrough
CT: control target
= control target key end

     0   :  { %7 = vsyncpa [#allocation3], 0  ;;  %s755_s0 = inlined_call_operand.hbm [shape: f32[2,8,32], index: 0, kind: input, shape index: {}]   ;;  %s756_s1 = inlined_call_operand.hbm [shape: f32[32,32], index: 1, kind: input, shape index: {}]   ;;  %s757_s2 = inlined_call_operand.hbm [shape: f32[2,8,32], index: 2, kind: output, shape index: {}]  }
   0x1   :  { %9 = vsyncpa [#allocation3 + $0x1], 0 }
   0x2   :  { %10 = vsyncpa [#allocation6], 0 }
   0x3   :  { %11 = vsyncpa [#allocation4], 0 }
   0x4   :  { %13 = vsyncpa [#allocation4 + $0x1], 0  ;;  %s612_s9 = smov 0   ;;  %s614_s10 = smov 0  }
   0x5   :  { %s616_s11 = smov 0   ;;  %s618_s12 = smov 0  }
   0x6   :  { %s620_s13 = smov 0   ;;  %s622_s14 = smov 0  }
   0x7 LB: > { %s355_s15 = sadd.s32 4294967295, %s592_s14   ;;  %p357_p0 = scmp.ge.s32.totalorder %s592_s14, 1  ;;  %s592_s14 = sphi %s622_s14, %s19_s14   ;;  %s588_s13 = sphi %s620_s13, %s768_s13   ;;  %s584_s12 = sphi %s618_s12, %s767_s12   ;;  %s580_s11 = sphi %s616_s11, %s766_s11   ;;  %s576_s10 = sphi %s614_s10, %s765_s10   ;;  %s572_s9 = sphi %s612_s9, %s764_s9  }
   0x8   : > { %p644_p1 = scmp.eq.s32.totalorder %s355_s15, 0  ;;  %p127_p2 = scmp.lt.s32.totalorder %s592_s14, 3 }
   0x9   : > { %s140_s19 = sshll.u32 %s756_s1, 4  ;;  %s594_s21 = smov [#allocation5]   ;;  %s141_s19 = int_to_ptr.hbm [resolvable:$true] %s140_s19 }
   0xa   : > { %p652_p3 = pnand %p357_p0, %p127_p2  ;;  %s142_s22 = sshll.u32 %s594_s21, 4  ;;  %s143_s22 = int_to_ptr.vmem [resolvable:$true] %s142_s22 }
   0xb   : > { %p359_p6 = scmp.ge.s32.totalorder %s592_s14, 2  ;;  %s595_s23 = smov 128  }
   0xc   : > { %p379_p4 = pneg %p652_p3  ;;  %s596_s24 = smov 8  }
   0xd   : > { %s356_s25 = sadd.s32 4294967294, %s592_s14   ;;  %s38_s26 = sadd.s32 1, %s588_s13 }
   0xe   : > { %p380_p5 = pnand %p379_p4, %p644_p1  ;;  %s47_s27 = sadd.s32 1, %s580_s11 }
   0xf   : > { %p40_p7 = scmp.ge.s32.totalorder %s38_s26, 2  ;;  %p54_p8 = scmp.ne.s32.totalorder %s580_s11, %s576_s10 }
  0x10   : > { %382 = dma.hbm_to_vmem [thread:$0]  (!%p380_p5), %s141_s19, 512, %s143_s22, [#allocation6], %s595_s23, %s595_s23, %s596_s24  }
  0x11   : > { %p55_p9 = scmp.eq.s32.totalorder %s592_s14, 0  ;;  %p60_p10 = scmp.ne.s32.totalorder %s576_s10, %s572_s9 }
  0x12   : > { %s770_s26 = smov (%p40_p7, %s38_s26), 0  ;;  %p114_p13 = scmp.eq.s32.totalorder %s355_s15, 1 }
  0x13   : > { %p671_p11 = por %p55_p9, %p54_p8  ;;  %p677_p12 = por %p644_p1, %p60_p10 }
  0x14   : > { %s42_s30 = ssub.s32 %s588_s13, %s770_s26  ;;  %p120_p2 = scmp.eq.s32.totalorder %s356_s25, 1 }
  0x15   : > { %p45_p0 = scmp.eq.s32.totalorder %s42_s30, 0  ;;  %p683_p4 = por %p114_p13, %p54_p8 }
  0x16   : > { %p392_p5 = scmp.lt.s32.totalorder %s592_s14, 2  ;;  %p691_p7 = por %p120_p2, %p60_p10 }
  0x17   : > { %s689_s4 = scalar_select %p45_p0, %s580_s11, %s47_s27  }
  0x18   : > { %s156_s6 = sand.u32 1, %s580_s11   ;;  %s361_s8 = sshll.u32 %s588_s13, 3 }
  0x19   : > { %s360_s7 = sshll.u32 %s156_s6, 3  ;;  %s165_s15 = scalar_lea.hbm %s755_s0, %s361_s8 }
  0x1a   : > { %s160_s19 = scalar_lea.vmem [#allocation2], %s360_s7  ;;  %s167_s22 = sshll.u32 %s165_s15, 4  ;;  %s168_s22 = int_to_ptr.hbm [resolvable:$true] %s167_s22 }
  0x1b   : > { %s169_s21 = sshll.u32 %s160_s19, 4  ;;  %p384_p8 = pnand %p392_p5, %p671_p11  ;;  %s170_s21 = int_to_ptr.vmem [resolvable:$true] %s169_s21 }
  0x1c   : > { %s157_s23 = scalar_lea.sflag [#allocation3], %s156_s6  ;;  %178 = sbr.rel (%p652_p3) target bundleno = 173 (0xad), region = 28 }
  0x1d   : > { %386 = dma.hbm_to_vmem [thread:$0]  (!%p384_p8), %s168_s22, 128, %s170_s21, %s157_s23  }
  0x1e   : > { %s705_s24 = sand.u32 (!%p652_p3), 1, %s576_s10  }
  0x1f   : > { %s363_s25 = sshll.u32 (!%p652_p3), %s705_s24, 3  ;;  %s181_s27 = scalar_lea.sflag (!%p652_p3), [#allocation3], %s705_s24 }
  0x20   : > { %s184_s30 = scalar_lea.vmem (!%p652_p3), [#allocation2], %s363_s25 }
  0x21   : > { %559 = dma.done.wait (%p677_p12), %s181_s27, 128  }
  0x22   : > { %561 = vsyncadd (%p677_p12), %s181_s27, 4294967168 }
  0x23   : > { %563 = dma.done.wait (%p644_p1), [#allocation6], 512  }
  0x24   : > { %565 = vsyncadd (%p644_p1), [#allocation6], 4294966784  ;;  %v215_v0 = vld [vmem:[#allocation5 + $0x18] sm:$0xff]  ;;  %v214_v1 = vld [vmem:[#allocation5 + $0x10] sm:$0xff]  ;;  %vm216_vm0 = vcmask 261120   ;;  %s368_s20 = sshll.u32 %s584_s12, 3 }
  0x25   : > { %232 = vmatpush.msra.mxu0 %v215_v0  ;;  %v213_v2 = vld [vmem:[#allocation5 + $0x8] sm:$0xff]  ;;  %v212_v3 = vld [vmem:[#allocation5] sm:$0xff]  ;;  %v211_v4 = vld [vmem:[%s184_s30] sm:$0xff]  ;;  %s254_s16 = scalar_lea.hbm %s757_s2, %s368_s20  ;;  %s210_s6 = scalar_lea.vmem [#allocation7], %s363_s25 }
  0x26   : > { %s256_s7 = sshll.u32 %s210_s6, 4  ;;  %s258_s8 = sshll.u32 %s254_s16, 4  ;;  %s257_s7 = int_to_ptr.vmem [resolvable:$true] %s256_s7  ;;  %s259_s8 = int_to_ptr.hbm [resolvable:$true] %s258_s8 }
  0x27   : > { %233 = vmatpush.msra.mxu0 %v214_v1  ;;  %s242_s17 = scalar_lea.sflag [#allocation4], %s705_s24  ;;  %s520_s18 = sshra.s32 %s259_s8, 4  ;;  %s521_s18 = int_to_ptr.hbm [resolvable:$true] %s520_s18 }
  0x28   : > { %s522_s15 = scalar_lea.hbm %s521_s18, 8  ;;  %s526_s21 = scalar_lea.hbm %s757_s2, 16 }
  0x29   : > { %234 = vmatpush.msra.mxu0 %v213_v2  ;;  %p523_p1 = scmp.ne.s32.totalorder %s521_s18, %s522_s15  ;;  %p527_p10 = scmp.lt.s32.totalorder %s521_s18, %s757_s2 }
  0x2a   : > { %p528_p11 = scmp.lt.s32.totalorder %s526_s21, %s522_s15 }
  0x2b   : > { %235 = vmatpush.msra.mxu0 %v212_v3  ;;  %p524_p3 = pnand %p523_p1, %p683_p4 }
  0x2c   : > { %366 = vmatmul.msk.f32.vlgmr.msra.gmra.mxu0 %vm216_vm0, %v211_v4  ;;  %p529_p12 = por %p528_p11, %p527_p10 }
  0x2d   : > { %p525_p9 = pneg %p524_p3 }
  0x2f   : > { %p530_p13 = pnand %p529_p12, %p525_p9 }
  0xa9   : > { %v237_v5 = vpop.f32.mrf.mxu0 }
  0xaa   : > { %240 = vst.msk [vmem:[%s210_s6] sm:$0xff] %vm216_vm0, %v237_v5 }
  0xab   : > { %533 = shalt.err (!%p530_p13)
}
  0xac   : > { %377 = dma.vmem_to_hbm [thread:$0]  (%p683_p4), %s257_s7, 128, %s259_s8, %s242_s17  }
  0xad PF: > { %s270_s24 = sand.u32 1, %s572_s9   ;;  %p388_p0 = pnand %p359_p6, %p691_p7 }
  0xae   : > { %s271_s25 = scalar_lea.sflag [#allocation4], %s270_s24 }
  0xaf   : > { %p389_p2 = pneg %p388_p0 }
  0xb1   : > { %567 = dma.done.wait (%p389_p2), %s271_s25, 128  }
  0xb2   : > { %569 = vsyncadd (%p389_p2), %s271_s25, 4294967168  ;;  %s19_s14 = sadd.s32 1, %s592_s14   ;;  %s764_s9 = smov %s576_s10 }
  0xb3   : > { %p16_p5 = scmp.ge.s32.totalorder %s19_s14, 4   ;;  %s765_s10 = smov %s580_s11 }
  0xb4   : > { %s766_s11 = smov %s689_s4  ;;  %s767_s12 = smov %s588_s13 }
  0xb5   : > { %s768_s13 = smov %s770_s26  ;;  %18 = sbr.rel (!%p16_p5) target bundleno = 7 (0x7), region = 78 }
  0xba   :  { %277 = vsyncpa [#allocation3], 1 }
  0xbb   :  { %279 = vsyncpa [#allocation3 + $0x1], 1 }
  0xbc   :  { %280 = vsyncpa [#allocation6], 1 }
  0xbd   :  { %281 = vsyncpa [#allocation4], 1 }
  0xbe   :  { %283 = vsyncpa [#allocation4 + $0x1], 1 }

</bundles_post_ra>
